<compile_context>
chip_gen: v7x
topology: tpu7x:2x2x1
jax: 0.10.0
libtpu: 0.0.40
codegen_flags: <defaults>
</compile_context>

<pallas_src>
import jax
import jax.numpy as jnp
from jax.experimental import pallas as pl
from jax.experimental.pallas import tpu as pltpu

CLASSES = 3
K_IN = 1600          # 1 * 40 * 40 flattened input features
HID = 128
OUT_PAD = 128        # logits padded 3 -> 128 cols so the final store is lane-dense
TB_MAX = 1024        # max batch rows per grid step (sized for 32 MiB scoped VMEM)


def _round_up(v, m):
    return (v + m - 1) // m * m


def _mlp_kernel(x_ref, w1_ref, wh_ref, w6_ref, b_ref, out_ref):
    """Fused 6-layer MLP with ReLU after every layer (matches the torch module).

    x arrives as raw f32 rows (no wrapper-side pad/cast); the bf16 cast for the
    MXU happens here.  All matmuls accumulate in f32; bias + ReLU stay in f32.
    """
    b_all = b_ref[...]                                        # (6, 128) f32

    # fc1: (TB, 1600)bf16 @ (1600, 128)bf16 -> f32 accumulation.
    h = jnp.dot(x_ref[...].astype(jnp.bfloat16), w1_ref[...],
                preferred_element_type=jnp.float32)
    h = jnp.maximum(h + b_all[0:1, :], 0.0)

    # fc2..fc5: four VMEM-resident (128, 128) hidden layers.
    for i in range(4):
        h = jnp.dot(h.astype(jnp.bfloat16), wh_ref[i],
                    preferred_element_type=jnp.float32)
        h = jnp.maximum(h + b_all[i + 1:i + 2, :], 0.0)

    # fc6: output columns padded to 128 (padded W cols / bias lanes are zero,
    # so padded logits are relu(0) == 0 and get sliced off in the wrapper).
    h = jnp.dot(h.astype(jnp.bfloat16), w6_ref[...],
                preferred_element_type=jnp.float32)
    h = jnp.maximum(h + b_all[5:6, :], 0.0)

    out_ref[...] = h.astype(out_ref.dtype)                    # bf16 writeback


def prepare_params(params):
    """One-time parameter prep (keep OUT of the per-call forward path).

    params: list of (W, b) with W shaped (out, in) like torch.nn.Linear.
    Returns pre-transposed / padded / bf16-cast / packed arrays:
      w1t   : (1600, 128) bf16
      wh    : (4, 128, 128) bf16 (fc2..fc5, already (in, out))
      w6p   : (128, 128) bf16    (cols CLASSES..127 zero)
      b_all : (6, 128) f32       (each row zero-padded to 128 lanes)
    """
    w1t = params[0][0].T.astype(jnp.bfloat16)                 # (1600, 128)

    wh = jnp.stack([params[i][0].T for i in range(1, 5)]).astype(jnp.bfloat16)

    w6 = params[5][0]                                         # (CLASSES, 128)
    w6p = jnp.zeros((HID, OUT_PAD), jnp.bfloat16)
    w6p = w6p.at[:, :CLASSES].set(w6.T.astype(jnp.bfloat16))

    b_all = jnp.zeros((6, OUT_PAD), jnp.float32)
    for i, (_, b) in enumerate(params):
        b_all = b_all.at[i, :b.shape[0]].set(b.astype(jnp.float32))

    return (w1t, wh, w6p, b_all)


def linear_net40_forward(x_nchw, prepared):
    """Forward pass. `prepared` comes from prepare_params(params)."""
    w1t, wh, w6p, b_all = prepared

    B = x_nchw.shape[0]
    x = x_nchw.reshape(B, -1)                                 # (B, 1600), no copy
    assert x.shape[1] == K_IN

    # Batch tiling:
    #   * up to TB_MAX rows per grid step (amortizes per-step overhead, ~85%+
    #     of HBM roofline),
    #   * >=2 steps once B >= TB_MAX so v7x's 2 TensorCores both get work
    #     (the axis is marked "parallel"),
    #   * TB rounded to 16 (bf16 sublane pair) so padding waste is <16 rows
    #     per step instead of up to +70% for awkward batch sizes.
    G = max(pl.cdiv(B, TB_MAX), 2 if B >= TB_MAX else 1)
    TB = _round_up(max(pl.cdiv(B, G), 1), 16)
    Bp = TB * G

    # No cast, no column pad: x streams into the kernel as raw f32 rows.
    # Only batch sizes that are not a multiple of 16 pay a small row-pad copy.
    if Bp != B:
        x = jnp.pad(x, ((0, Bp - B), (0, 0)))

    grid = (G,)
    in_specs = [
        pl.BlockSpec((TB, K_IN), lambda i: (i, 0)),           # x tile streams
        pl.BlockSpec((K_IN, HID), lambda i: (0, 0)),          # weights: constant
        pl.BlockSpec((4, HID, HID), lambda i: (0, 0, 0)),     #   block index ->
        pl.BlockSpec((HID, OUT_PAD), lambda i: (0, 0)),       #   VMEM-resident
        pl.BlockSpec((6, OUT_PAD), lambda i: (0, 0)),
    ]
    out_specs = pl.BlockSpec((TB, OUT_PAD), lambda i: (i, 0))

    flops = 2 * Bp * (K_IN * HID + 4 * HID * HID + HID * OUT_PAD)
    bytes_accessed = (Bp * K_IN * 4                           # f32 x stream
                      + w1t.size * 2 + wh.size * 2 + w6p.size * 2
                      + b_all.size * 4
                      + Bp * OUT_PAD * 2)                     # bf16 writeback

    out = pl.pallas_call(
        _mlp_kernel,
        grid_spec=pltpu.PrefetchScalarGridSpec(
            num_scalar_prefetch=0,
            grid=grid,
            in_specs=in_specs,
            out_specs=out_specs,
        ),
        out_shape=jax.ShapeDtypeStruct((Bp, OUT_PAD), jnp.bfloat16),
        compiler_params=pltpu.CompilerParams(
            # Shard batch tiles across TensorCores (v7x); explicit VMEM budget
            # so the 1024-row tile is portable (v5e default scoped is 16 MiB,
            # v7x physical is 64 MiB).
            dimension_semantics=("parallel",),
            vmem_limit_bytes=32 * 1024 * 1024,
        ),
        cost_estimate=pl.CostEstimate(
            flops=flops, transcendentals=0, bytes_accessed=bytes_accessed),
    )(x, w1t, wh, w6p, b_all)

    logits = out[:B, :CLASSES].astype(jnp.float32)
    return logits, logits                                     # torch forward returns (x, x)


def init_params(key):
    """Deterministic parameter init (torch.nn.Linear-style uniform bounds)."""
    dims = [K_IN, HID, HID, HID, HID, HID, CLASSES]
    params = []
    for i in range(6):
        fan_in, fan_out = dims[i], dims[i + 1]
        key, kw, kb = jax.random.split(key, 3)
        bound = 1.0 / jnp.sqrt(fan_in)
        W = jax.random.uniform(kw, (fan_out, fan_in), jnp.float32, -bound, bound)
        b = jax.random.uniform(kb, (fan_out,), jnp.float32, -bound, bound)
        params.append((W, b))
    return params


def _reference_forward_f32(x_nchw, params):
    """Pure-JAX f32 reference (exact torch semantics)."""
    h = x_nchw.reshape(x_nchw.shape[0], -1)
    for (W, b) in params:
        h = jnp.maximum(h @ W.T + b, 0.0)
    return h


def _reference_forward_bf16(x_nchw, params):
    """Pure-JAX reference with the same mixed precision as the kernel."""
    h = x_nchw.reshape(x_nchw.shape[0], -1)
    for (W, b) in params:
        y = jnp.dot(h.astype(jnp.bfloat16), W.T.astype(jnp.bfloat16),
                    preferred_element_type=jnp.float32)
        h = jnp.maximum(y + b, 0.0)
    return h


if __name__ == "__main__":
    key = jax.random.PRNGKey(0)
    key, kx = jax.random.split(key)
    # Input consistent with the 1600-feature flatten: (B=2, C=1, H=40, W=40).
    x = jax.random.normal(kx, (2, 1, 40, 40), jnp.float32)
    params = init_params(key)
    prepared = prepare_params(params)

    out1, out2 = linear_net40_forward(x, prepared)
    jax.block_until_ready(out1)

    ref_bf16 = _reference_forward_bf16(x, params)
    ref_f32 = _reference_forward_f32(x, params)

    assert out1.shape == (2, CLASSES)
    # Matches the mixed-precision reference up to the final bf16 store ...
    assert jnp.allclose(out1, ref_bf16, atol=1e-2, rtol=1e-2)
    # ... and the full-f32 reference within bf16 quantization error.
    assert jnp.allclose(out1, ref_f32, atol=5e-2, rtol=5e-2)
    assert jnp.array_equal(out1, out2)
    print("KERNEL_OK")
</pallas_src>

<mosaic_0001>
module attributes {stable_mosaic.version = 11 : i64} {
  func.func @_mlp_kernel(%arg0: i32, %arg1: memref<16x1600xf32, #tpu.memory_space<vmem>>, %arg2: memref<1600x128xbf16, #tpu.memory_space<vmem>>, %arg3: memref<4x128x128xbf16, #tpu.memory_space<vmem>>, %arg4: memref<128x128xbf16, #tpu.memory_space<vmem>>, %arg5: memref<6x128xf32, #tpu.memory_space<vmem>>, %arg6: memref<16x128xbf16, #tpu.memory_space<vmem>>) attributes {dimension_semantics = [#tpu.dimension_semantics<parallel>], iteration_bounds = array<i64: 1>, scalar_prefetch = 0 : i64, scratch_operands = 0 : i64, tpu.core_type = #tpu.core_type<tc>, window_params = [{transform_indices = @transform_0, window_bounds = array<i64: 16, 1600>}, {pipeline_mode = #tpu.pipeline_mode<synchronous>, transform_indices = @transform_1, window_bounds = array<i64: 1600, 128>}, {pipeline_mode = #tpu.pipeline_mode<synchronous>, transform_indices = @transform_2, window_bounds = array<i64: 4, 128, 128>}, {pipeline_mode = #tpu.pipeline_mode<synchronous>, transform_indices = @transform_3, window_bounds = array<i64: 128, 128>}, {pipeline_mode = #tpu.pipeline_mode<synchronous>, transform_indices = @transform_4, window_bounds = array<i64: 6, 128>}, {transform_indices = @transform_5, window_bounds = array<i64: 16, 128>}]} {
    %c0 = arith.constant 0 : index
    %c0_0 = arith.constant 0 : index
    %0 = vector.load %arg5[%c0, %c0_0] : memref<6x128xf32, #tpu.memory_space<vmem>>, vector<6x128xf32>
    %c0_1 = arith.constant 0 : index
    %c0_2 = arith.constant 0 : index
    %1 = vector.load %arg1[%c0_1, %c0_2] : memref<16x1600xf32, #tpu.memory_space<vmem>>, vector<16x1600xf32>
    %2 = arith.truncf %1 : vector<16x1600xf32> to vector<16x1600xbf16>
    %c0_3 = arith.constant 0 : index
    %c0_4 = arith.constant 0 : index
    %3 = vector.load %arg2[%c0_3, %c0_4] : memref<1600x128xbf16, #tpu.memory_space<vmem>>, vector<1600x128xbf16>
    %cst = arith.constant dense<0.000000e+00> : vector<16x128xf32>
    %4 = tpu.matmul %2, %3, %cst {dimension_numbers = #tpu.dot_dimension_numbers<[1], [0], [0], [1], [0, 0, 1, 1], [], []>} : vector<16x1600xbf16>, vector<1600x128xbf16>, vector<16x128xf32> -> vector<16x128xf32>
    %5 = vector.extract_strided_slice %0 {offsets = [0, 0], sizes = [1, 128], strides = [1, 1]} : vector<6x128xf32> to vector<1x128xf32>
    %6 = vector.broadcast %5 : vector<1x128xf32> to vector<16x128xf32>
    %7 = arith.addf %4, %6 : vector<16x128xf32>
    %cst_5 = arith.constant 0.000000e+00 : f32
    %8 = vector.broadcast %cst_5 : f32 to vector<16x128xf32>
    %9 = arith.maximumf %7, %8 : vector<16x128xf32>
    %10 = arith.truncf %9 : vector<16x128xf32> to vector<16x128xbf16>
    %c0_6 = arith.constant 0 : index
    %c0_7 = arith.constant 0 : index
    %c0_8 = arith.constant 0 : index
    %11 = vector.load %arg3[%c0_6, %c0_7, %c0_8] : memref<4x128x128xbf16, #tpu.memory_space<vmem>>, vector<1x128x128xbf16>
    %12 = vector.shape_cast %11 : vector<1x128x128xbf16> to vector<128x128xbf16>
    %cst_9 = arith.constant dense<0.000000e+00> : vector<16x128xf32>
    %13 = tpu.matmul %10, %12, %cst_9 {dimension_numbers = #tpu.dot_dimension_numbers<[1], [0], [0], [1], [0, 0, 1, 1], [], []>} : vector<16x128xbf16>, vector<128x128xbf16>, vector<16x128xf32> -> vector<16x128xf32>
    %14 = vector.extract_strided_slice %0 {offsets = [1, 0], sizes = [1, 128], strides = [1, 1]} : vector<6x128xf32> to vector<1x128xf32>
    %15 = vector.broadcast %14 : vector<1x128xf32> to vector<16x128xf32>
    %16 = arith.addf %13, %15 : vector<16x128xf32>
    %cst_10 = arith.constant 0.000000e+00 : f32
    %17 = vector.broadcast %cst_10 : f32 to vector<16x128xf32>
    %18 = arith.maximumf %16, %17 : vector<16x128xf32>
    %19 = arith.truncf %18 : vector<16x128xf32> to vector<16x128xbf16>
    %c1 = arith.constant 1 : index
    %c0_11 = arith.constant 0 : index
    %c0_12 = arith.constant 0 : index
    %20 = vector.load %arg3[%c1, %c0_11, %c0_12] : memref<4x128x128xbf16, #tpu.memory_space<vmem>>, vector<1x128x128xbf16>
    %21 = vector.shape_cast %20 : vector<1x128x128xbf16> to vector<128x128xbf16>
    %cst_13 = arith.constant dense<0.000000e+00> : vector<16x128xf32>
    %22 = tpu.matmul %19, %21, %cst_13 {dimension_numbers = #tpu.dot_dimension_numbers<[1], [0], [0], [1], [0, 0, 1, 1], [], []>} : vector<16x128xbf16>, vector<128x128xbf16>, vector<16x128xf32> -> vector<16x128xf32>
    %23 = vector.extract_strided_slice %0 {offsets = [2, 0], sizes = [1, 128], strides = [1, 1]} : vector<6x128xf32> to vector<1x128xf32>
    %24 = vector.broadcast %23 : vector<1x128xf32> to vector<16x128xf32>
    %25 = arith.addf %22, %24 : vector<16x128xf32>
    %cst_14 = arith.constant 0.000000e+00 : f32
    %26 = vector.broadcast %cst_14 : f32 to vector<16x128xf32>
    %27 = arith.maximumf %25, %26 : vector<16x128xf32>
    %28 = arith.truncf %27 : vector<16x128xf32> to vector<16x128xbf16>
    %c2 = arith.constant 2 : index
    %c0_15 = arith.constant 0 : index
    %c0_16 = arith.constant 0 : index
    %29 = vector.load %arg3[%c2, %c0_15, %c0_16] : memref<4x128x128xbf16, #tpu.memory_space<vmem>>, vector<1x128x128xbf16>
    %30 = vector.shape_cast %29 : vector<1x128x128xbf16> to vector<128x128xbf16>
    %cst_17 = arith.constant dense<0.000000e+00> : vector<16x128xf32>
    %31 = tpu.matmul %28, %30, %cst_17 {dimension_numbers = #tpu.dot_dimension_numbers<[1], [0], [0], [1], [0, 0, 1, 1], [], []>} : vector<16x128xbf16>, vector<128x128xbf16>, vector<16x128xf32> -> vector<16x128xf32>
    %32 = vector.extract_strided_slice %0 {offsets = [3, 0], sizes = [1, 128], strides = [1, 1]} : vector<6x128xf32> to vector<1x128xf32>
    %33 = vector.broadcast %32 : vector<1x128xf32> to vector<16x128xf32>
    %34 = arith.addf %31, %33 : vector<16x128xf32>
    %cst_18 = arith.constant 0.000000e+00 : f32
    %35 = vector.broadcast %cst_18 : f32 to vector<16x128xf32>
    %36 = arith.maximumf %34, %35 : vector<16x128xf32>
    %37 = arith.truncf %36 : vector<16x128xf32> to vector<16x128xbf16>
    %c3 = arith.constant 3 : index
    %c0_19 = arith.constant 0 : index
    %c0_20 = arith.constant 0 : index
    %38 = vector.load %arg3[%c3, %c0_19, %c0_20] : memref<4x128x128xbf16, #tpu.memory_space<vmem>>, vector<1x128x128xbf16>
    %39 = vector.shape_cast %38 : vector<1x128x128xbf16> to vector<128x128xbf16>
    %cst_21 = arith.constant dense<0.000000e+00> : vector<16x128xf32>
    %40 = tpu.matmul %37, %39, %cst_21 {dimension_numbers = #tpu.dot_dimension_numbers<[1], [0], [0], [1], [0, 0, 1, 1], [], []>} : vector<16x128xbf16>, vector<128x128xbf16>, vector<16x128xf32> -> vector<16x128xf32>
    %41 = vector.extract_strided_slice %0 {offsets = [4, 0], sizes = [1, 128], strides = [1, 1]} : vector<6x128xf32> to vector<1x128xf32>
    %42 = vector.broadcast %41 : vector<1x128xf32> to vector<16x128xf32>
    %43 = arith.addf %40, %42 : vector<16x128xf32>
    %cst_22 = arith.constant 0.000000e+00 : f32
    %44 = vector.broadcast %cst_22 : f32 to vector<16x128xf32>
    %45 = arith.maximumf %43, %44 : vector<16x128xf32>
    %46 = arith.truncf %45 : vector<16x128xf32> to vector<16x128xbf16>
    %c0_23 = arith.constant 0 : index
    %c0_24 = arith.constant 0 : index
    %47 = vector.load %arg4[%c0_23, %c0_24] : memref<128x128xbf16, #tpu.memory_space<vmem>>, vector<128x128xbf16>
    %cst_25 = arith.constant dense<0.000000e+00> : vector<16x128xf32>
    %48 = tpu.matmul %46, %47, %cst_25 {dimension_numbers = #tpu.dot_dimension_numbers<[1], [0], [0], [1], [0, 0, 1, 1], [], []>} : vector<16x128xbf16>, vector<128x128xbf16>, vector<16x128xf32> -> vector<16x128xf32>
    %49 = vector.extract_strided_slice %0 {offsets = [5, 0], sizes = [1, 128], strides = [1, 1]} : vector<6x128xf32> to vector<1x128xf32>
    %50 = vector.broadcast %49 : vector<1x128xf32> to vector<16x128xf32>
    %51 = arith.addf %48, %50 : vector<16x128xf32>
    %cst_26 = arith.constant 0.000000e+00 : f32
    %52 = vector.broadcast %cst_26 : f32 to vector<16x128xf32>
    %53 = arith.maximumf %51, %52 : vector<16x128xf32>
    %54 = arith.truncf %53 : vector<16x128xf32> to vector<16x128xbf16>
    %c0_27 = arith.constant 0 : index
    %c0_28 = arith.constant 0 : index
    %55 = vector.load %arg6[%c0_27, %c0_28] : memref<16x128xbf16, #tpu.memory_space<vmem>>, vector<16x128xbf16>
    tpu.vector_store %arg6[%c0_27, %c0_28], %54 {strides = array<i32>} : memref<16x128xbf16, #tpu.memory_space<vmem>>, vector<16x128xbf16>,
    return
  }
  func.func @transform_0(%arg0: i32) -> (i32, i32) {
    %c0_i32 = arith.constant 0 : i32
    %c0_i32_0 = arith.constant 0 : i32
    return %arg0, %c0_i32 : i32, i32
  }
  func.func @transform_1(%arg0: i32) -> (i32, i32) {
    %c0_i32 = arith.constant 0 : i32
    %c0_i32_0 = arith.constant 0 : i32
    %c0_i32_1 = arith.constant 0 : i32
    return %c0_i32, %c0_i32_0 : i32, i32
  }
  func.func @transform_2(%arg0: i32) -> (i32, i32, i32) {
    %c0_i32 = arith.constant 0 : i32
    %c0_i32_0 = arith.constant 0 : i32
    %c0_i32_1 = arith.constant 0 : i32
    %c0_i32_2 = arith.constant 0 : i32
    return %c0_i32, %c0_i32_0, %c0_i32_1 : i32, i32, i32
  }
  func.func @transform_3(%arg0: i32) -> (i32, i32) {
    %c0_i32 = arith.constant 0 : i32
    %c0_i32_0 = arith.constant 0 : i32
    %c0_i32_1 = arith.constant 0 : i32
    return %c0_i32, %c0_i32_0 : i32, i32
  }
  func.func @transform_4(%arg0: i32) -> (i32, i32) {
    %c0_i32 = arith.constant 0 : i32
    %c0_i32_0 = arith.constant 0 : i32
    %c0_i32_1 = arith.constant 0 : i32
    return %c0_i32, %c0_i32_0 : i32, i32
  }
  func.func @transform_5(%arg0: i32) -> (i32, i32) {
    %c0_i32 = arith.constant 0 : i32
    %c0_i32_0 = arith.constant 0 : i32
    return %arg0, %c0_i32 : i32, i32
  }
}

</mosaic_0001>

<bundles_post_ra>
// kernel: tpu_custom_call.1
= control target key start
LH: loop header
LB: loop body
LE: loop exit
PB: predicated region body
PF: predicated region fallthrough
CT: control target
= control target key end

     0   :  { %10 = vsyncpa [#allocation3], 0  ;;  %s2714_s0 = inlined_call_operand.hbm [shape: f32[16,1600], index: 0, kind: input, shape index: {}]   ;;  %s2715_s1 = inlined_call_operand.hbm [shape: bf16[1600,128], index: 1, kind: input, shape index: {}]   ;;  %s2716_s2 = inlined_call_operand.hbm [shape: bf16[4,128,128], index: 2, kind: input, shape index: {}]   ;;  %s2717_s3 = inlined_call_operand.hbm [shape: bf16[128,128], index: 3, kind: input, shape index: {}]   ;;  %s2718_s4 = inlined_call_operand.vmem [shape: f32[6,128], index: 4, kind: input, shape index: {}]   ;;  %s2719_s5 = inlined_call_operand.hbm [shape: bf16[16,128], index: 5, kind: output, shape index: {}]  }
   0x1   :  { %11 = vsyncpa [#allocation6], 0 }
   0x2   :  { %12 = vsyncpa [#allocation9], 0 }
   0x3   :  { %13 = vsyncpa [#allocation4], 0  ;;  %s2519_s18 = smov [#allocation5]   ;;  %s2401_s22 = scalar_lea.hbm %s2715_s1, 12800 }
   0x4   :  { %s31_s19 = sshll.u32 %s2519_s18, 4  ;;  %p2402_p0 = scmp.ne.s32.totalorder %s2715_s1, %s2401_s22  ;;  %s32_s19 = int_to_ptr.vmem [resolvable:$true] %s31_s19 }
   0x5   :  { %p2405_p1 = scmp.lt.u32.totalorder %s2401_s22, %s2715_s1 }
   0x7   :  { %p2407_p2 = pnand %p2405_p1, %p2402_p0 }
   0x9   :  { %2410 = shalt.err (!%p2407_p2)
}
   0xa   :  { %s2411_s27 = scalar_lea.vmem %s32_s19, 12800  ;;  %p2416_p4 = scmp.lt.s32.totalorder %s32_s19, %s32_s19 }
   0xb   :  { %p2412_p3 = scmp.ne.s32.totalorder %s32_s19, %s2411_s27  ;;  %p2417_p5 = scmp.lt.s32.totalorder %s2411_s27, %s2411_s27 }
   0xd   :  { %p2418_p6 = por %p2417_p5, %p2416_p4 }
   0xf   :  { %p2419_p7 = pnand %p2418_p6, %p2412_p3 }
  0x11   :  { %2422 = shalt.err (!%p2419_p7)
}
  0x12   :  { %s2520_s28 = smov 64   ;;  %s2521_s29 = smov 4  }
  0x13   :  { %37 = dma.hbm_to_vmem [thread:$0]  %s2715_s1, 12800, %s32_s19, [#allocation6], %s2520_s28, %s2520_s28, %s2521_s29  }
  0x14   :  { %s2522_s7 = smov [#allocation2]   ;;  %s2423_s11 = scalar_lea.hbm %s2714_s0, 3328 }
  0x15   :  { %s19_s8 = sshll.u32 %s2522_s7, 4  ;;  %p2424_p8 = scmp.ne.s32.totalorder %s2714_s0, %s2423_s11  ;;  %s20_s8 = int_to_ptr.vmem [resolvable:$true] %s19_s8 }
  0x16   :  { %p2427_p9 = scmp.lt.u32.totalorder %s2423_s11, %s2714_s0 }
  0x18   :  { %p2429_p10 = pnand %p2427_p9, %p2424_p8 }
  0x1a   :  { %2432 = shalt.err (!%p2429_p10)
}
  0x1b   :  { %s2433_s16 = scalar_lea.vmem %s20_s8, 3328  ;;  %p2438_p12 = scmp.lt.s32.totalorder %s20_s8, %s20_s8 }
  0x1c   :  { %p2434_p11 = scmp.ne.s32.totalorder %s20_s8, %s2433_s16  ;;  %p2439_p13 = scmp.lt.s32.totalorder %s2433_s16, %s2433_s16 }
  0x1e   :  { %p2440_p0 = por %p2439_p13, %p2438_p12 }
  0x20   :  { %p2441_p1 = pnand %p2440_p0, %p2434_p11 }
  0x22   :  { %2444 = shalt.err (!%p2441_p1)
}
  0x23   :  { %s2523_s1 = smov 1664   ;;  %s2524_s17 = smov 104  }
  0x24   :  { %25 = dma.hbm_to_vmem [thread:$0]  %s2714_s0, 3328, %s20_s8, [#allocation3], %s2523_s1, %s2523_s1, %s2524_s17  }
  0x25   :  { %s2525_s20 = smov [#allocation7]   ;;  %s2526_s22 = smov [#allocation8]  }
  0x26   :  { %s43_s21 = sshll.u32 %s2525_s20, 4  ;;  %s55_s23 = sshll.u32 %s2526_s22, 4  ;;  %s44_s21 = int_to_ptr.vmem [resolvable:$true] %s43_s21  ;;  %s2587_s23 = int_to_ptr.vmem [resolvable:$true] %s55_s23 }
  0x27   :  { %s2445_s26 = scalar_lea.hbm %s2716_s2, 4096 }
  0x28   :  { %p2446_p2 = scmp.ne.s32.totalorder %s2716_s2, %s2445_s26  ;;  %p2449_p3 = scmp.lt.u32.totalorder %s2445_s26, %s2716_s2 }
  0x2a   :  { %p2451_p4 = pnand %p2449_p3, %p2446_p2 }
  0x2c   :  { %2454 = shalt.err (!%p2451_p4)
}
  0x2d   :  { %s2455_s0 = scalar_lea.vmem %s44_s21, 4096  ;;  %p2460_p6 = scmp.lt.s32.totalorder %s44_s21, %s44_s21 }
  0x2e   :  { %p2456_p5 = scmp.ne.s32.totalorder %s44_s21, %s2455_s0  ;;  %p2461_p7 = scmp.lt.s32.totalorder %s2455_s0, %s2455_s0 }
  0x30   :  { %p2462_p8 = por %p2461_p7, %p2460_p6 }
  0x32   :  { %p2463_p9 = pnand %p2462_p8, %p2456_p5 }
  0x34   :  { %2466 = shalt.err (!%p2463_p9)
}
  0x35   :  { %49 = dma.hbm_to_vmem [thread:$0]  %s2716_s2, 4096, %s44_s21, [#allocation6], %s2520_s28, %s2520_s28, %s2521_s29  }
  0x36   :  { %s2467_s12 = scalar_lea.hbm %s2717_s3, 1024 }
  0x37   :  { %p2468_p10 = scmp.ne.s32.totalorder %s2717_s3, %s2467_s12  ;;  %p2471_p11 = scmp.lt.u32.totalorder %s2467_s12, %s2717_s3 }
  0x39   :  { %p2473_p12 = pnand %p2471_p11, %p2468_p10 }
  0x3b   :  { %2476 = shalt.err (!%p2473_p12)
}
  0x3c   :  { %s2477_s1 = scalar_lea.vmem %s2587_s23, 1024  ;;  %p2482_p0 = scmp.lt.s32.totalorder %s2587_s23, %s2587_s23 }
  0x3d   :  { %p2478_p13 = scmp.ne.s32.totalorder %s2587_s23, %s2477_s1  ;;  %p2483_p1 = scmp.lt.s32.totalorder %s2477_s1, %s2477_s1 }
  0x3f   :  { %p2484_p2 = por %p2483_p1, %p2482_p0 }
  0x41   :  { %p2485_p3 = pnand %p2484_p2, %p2478_p13 }
  0x43   :  { %2488 = shalt.err (!%p2485_p3)
}
  0x44   :  { %61 = dma.hbm_to_vmem [thread:$0]  %s2717_s3, 1024, %s2587_s23, [#allocation9], %s2520_s28, %s2520_s28, %s2521_s29  }
  0x45   :  { %2511 = dma.done.wait [#allocation3], 3328  }
  0x46   :  { %2512 = vsyncadd [#allocation3], 4294963968 }
  0x47   :  { %2513 = dma.done.wait [#allocation6], 16896  }
  0x48   :  { %2514 = vsyncadd [#allocation6], 4294950400 }
  0x49   :  { %2515 = dma.done.wait [#allocation9], 1024  }
  0x4a   :  { %2516 = vsyncadd [#allocation9], 4294966272  ;;  %v2261_v0 = vld [vmem:[#allocation5 + $0x40] sm:$0xff]   ;;  %v2265_v4 = vld [vmem:[#allocation5 + $0x48] sm:$0xff]   ;;  %vm2528_vm0 = vmmov 0   ;;  %vm921_vm1 = vcmask 523264  }
  0x4b   :  { %v2262_v1 = vld [vmem:[#allocation5] sm:$0xff]   ;;  %1956 = vmatprep.subr.bf16.mxu0 %v2261_v0  ;;  %v2266_v5 = vld [vmem:[#allocation5 + $0x8] sm:$0xff]   ;;  %v2269_v8 = vld [vmem:[#allocation5 + $0x50] sm:$0xff]  }
  0x4c   :  { %v2263_v2 = vld [vmem:[#allocation5 + $0xc0] sm:$0xff]   ;;  %1957 = vmatpush3.bf16.msra.mxu0 %v2262_v1  ;;  %v2267_v6 = vld [vmem:[#allocation5 + $0xc8] sm:$0xff]   ;;  %v2270_v9 = vld [vmem:[#allocation5 + $0x10] sm:$0xff]  }
  0x4d   :  { %v2264_v3 = vld [vmem:[#allocation5 + $0x80] sm:$0xff]   ;;  %1978 = vmatprep.subr.bf16.mxu1 %v2263_v2  ;;  %1958 = vmatprep.subr.bf16.mxu0 %v2265_v4  ;;  %v2268_v7 = vld [vmem:[#allocation5 + $0x88] sm:$0xff]   ;;  %v2271_v10 = vld [vmem:[#allocation5 + $0xd0] sm:$0xff]  }
  0x4e   :  { %1979 = vmatpush3.bf16.msra.mxu1 %v2264_v3  ;;  %v2272_v11 = vld [vmem:[#allocation5 + $0x90] sm:$0xff]   ;;  %v2273_v12 = vld [vmem:[#allocation5 + $0x58] sm:$0xff]   ;;  %v2277_v16 = vld [vmem:[#allocation5 + $0x60] sm:$0xff]  }
  0x4f   :  { %1980 = vmatprep.subr.bf16.mxu1 %v2267_v6  ;;  %v2274_v13 = vld [vmem:[#allocation5 + $0x18] sm:$0xff]   ;;  %v2278_v17 = vld [vmem:[#allocation5 + $0x20] sm:$0xff]   ;;  %v2281_v20 = vld [vmem:[#allocation5 + $0x68] sm:$0xff]  }
  0x50   :  { %1959 = vmatpush3.bf16.msra.mxu0 %v2266_v5  ;;  %v2275_v14 = vld [vmem:[#allocation5 + $0xd8] sm:$0xff]   ;;  %v2279_v18 = vld [vmem:[#allocation5 + $0xe0] sm:$0xff]   ;;  %v2282_v21 = vld [vmem:[#allocation5 + $0x28] sm:$0xff]  }
  0x51   :  { %1960 = vmatprep.subr.bf16.mxu0 %v2269_v8  ;;  %v2276_v15 = vld [vmem:[#allocation5 + $0x98] sm:$0xff]   ;;  %v2280_v19 = vld [vmem:[#allocation5 + $0xa0] sm:$0xff]   ;;  %v2283_v22 = vld [vmem:[#allocation5 + $0xe8] sm:$0xff]  }
  0x52   :  { %1981 = vmatpush3.bf16.msra.mxu1 %v2268_v7  ;;  %v2284_v23 = vld [vmem:[#allocation5 + $0xa8] sm:$0xff]   ;;  %v2285_v24 = vld [vmem:[#allocation5 + $0x70] sm:$0xff]   ;;  %v2289_v28 = vld [vmem:[#allocation5 + $0x78] sm:$0xff]  }
  0x53   :  { %1982 = vmatprep.subr.bf16.mxu1 %v2271_v10  ;;  %v2286_v25 = vld [vmem:[#allocation5 + $0x30] sm:$0xff]   ;;  %v2290_v29 = vld [vmem:[#allocation5 + $0x38] sm:$0xff]   ;;  %v92_v32 = vld [vmem:[#allocation2 + $0x70] sm:$0xff] }
  0x54   :  { %1961 = vmatpush3.bf16.msra.mxu0 %v2270_v9  ;;  %v2287_v26 = vld [vmem:[#allocation5 + $0xf0] sm:$0xff]   ;;  %v2291_v30 = vld [vmem:[#allocation5 + $0xf8] sm:$0xff]   ;;  %v2293_v38 = vld [vmem:[#allocation5 + $0x140] sm:$0xff]  }
  0x55   :  { %1962 = vmatprep.subr.bf16.mxu0 %v2273_v12  ;;  %v2288_v27 = vld [vmem:[#allocation5 + $0xb0] sm:$0xff]   ;;  %v79_v31 = vld [vmem:[#allocation2 + $0x8] sm:$0xff]  ;;  %v81_v39 = vld [vmem:[#allocation2 + $0x18] sm:$0xff] }
  0x56   :  { %1983 = vmatpush3.bf16.msra.mxu1 %v2272_v11  ;;  %v105_v33 = vpack.c.bf16 %v92_v32, %v79_v31  ;;  %v2292_v34 = vld [vmem:[#allocation5 + $0xb8] sm:$0xff]   ;;  %v78_v35 = vld [vmem:[#allocation2] sm:$0xff]  ;;  %v2294_v42 = vld [vmem:[#allocation5 + $0x100] sm:$0xff]  }
  0x57   :  { %1984 = vmatprep.subr.bf16.mxu1 %v2275_v14  ;;  %v91_v36 = vld [vmem:[#allocation2 + $0x68] sm:$0xff]  ;;  %v94_v40 = vld [vmem:[#allocation2 + $0x80] sm:$0xff]  ;;  %v80_v43 = vld [vmem:[#allocation2 + $0x10] sm:$0xff] }
  0x58   :  { %1963 = vmatpush3.bf16.msra.mxu0 %v2274_v13  ;;  %957 = vmatprep.mubr.bf16.mxu0 %v105_v33  ;;  %v104_v37 = vpack.c.bf16 %v91_v36, %v78_v35  ;;  %v107_v41 = vpack.c.bf16 %v94_v40, %v81_v39  ;;  %v93_v44 = vld [vmem:[#allocation2 + $0x78] sm:$0xff]  ;;  %v2295_v46 = vld [vmem:[#allocation5 + $0x1c0] sm:$0xff]   ;;  %v2301_v52 = vld [vmem:[#allocation5 + $0x150] sm:$0xff]  }
  0x59   :  { %1964 = vmatprep.subr.bf16.mxu0 %v2277_v16  ;;  %v106_v45 = vpack.c.bf16 %v93_v44, %v80_v43  ;;  %v2296_v47 = vld [vmem:[#allocation5 + $0x180] sm:$0xff]   ;;  %v2297_v48 = vld [vmem:[#allocation5 + $0x148] sm:$0xff]   ;;  %v2302_v53 = vld [vmem:[#allocation5 + $0x110] sm:$0xff]  }
  0x5a   :  { %1985 = vmatpush3.bf16.msra.mxu1 %v2276_v15  ;;  %998 = vmatprep.mubr.bf16.mxu1 %v107_v41  ;;  %v2298_v49 = vld [vmem:[#allocation5 + $0x108] sm:$0xff]   ;;  %v2303_v54 = vld [vmem:[#allocation5 + $0x1d0] sm:$0xff]   ;;  %v2305_v56 = vld [vmem:[#allocation5 + $0x158] sm:$0xff]  }
  0x5b   :  { %1986 = vmatprep.subr.bf16.mxu1 %v2279_v18  ;;  %v2299_v50 = vld [vmem:[#allocation5 + $0x1c8] sm:$0xff]   ;;  %v2304_v55 = vld [vmem:[#allocation5 + $0x190] sm:$0xff]   ;;  %v2306_v57 = vld [vmem:[#allocation5 + $0x118] sm:$0xff]  }
  0x5c   :  { %1965 = vmatpush3.bf16.msra.mxu0 %v2278_v17  ;;  %v2300_v51 = vld [vmem:[#allocation5 + $0x188] sm:$0xff]   ;;  %v2307_v58 = vld [vmem:[#allocation5 + $0x1d8] sm:$0xff]   ;;  %v2309_v60 = vld [vmem:[#allocation5 + $0x160] sm:$0xff]  }
  0x5d   :  { %1966 = vmatprep.subr.bf16.mxu0 %v2281_v20  ;;  %v2308_v59 = vld [vmem:[#allocation5 + $0x198] sm:$0xff]   ;;  %v2310_v61 = vld [vmem:[#allocation5 + $0x120] sm:$0xff]   ;;  %v2313_v0 = vld [vmem:[#allocation5 + $0x168] sm:$0xff]  }
  0x5e   :  { %1987 = vmatpush3.bf16.msra.mxu1 %v2280_v19  ;;  %v2311_v62 = vld [vmem:[#allocation5 + $0x1e0] sm:$0xff]   ;;  %v2314_v1 = vld [vmem:[#allocation5 + $0x128] sm:$0xff]   ;;  %v2317_v4 = vld [vmem:[#allocation5 + $0x170] sm:$0xff]  }
  0x5f   :  { %1988 = vmatprep.subr.bf16.mxu1 %v2283_v22  ;;  %v2312_v63 = vld [vmem:[#allocation5 + $0x1a0] sm:$0xff]   ;;  %v2315_v2 = vld [vmem:[#allocation5 + $0x1e8] sm:$0xff]   ;;  %v2318_v5 = vld [vmem:[#allocation5 + $0x130] sm:$0xff]  }
  0x60   :  { %1967 = vmatpush3.bf16.msra.mxu0 %v2282_v21  ;;  %v2316_v3 = vld [vmem:[#allocation5 + $0x1a8] sm:$0xff]   ;;  %v2319_v6 = vld [vmem:[#allocation5 + $0x1f0] sm:$0xff]   ;;  %v2321_v8 = vld [vmem:[#allocation5 + $0x178] sm:$0xff]  }
  0x61   :  { %1968 = vmatprep.subr.bf16.mxu0 %v2285_v24  ;;  %v2320_v7 = vld [vmem:[#allocation5 + $0x1b0] sm:$0xff]   ;;  %v2322_v9 = vld [vmem:[#allocation5 + $0x138] sm:$0xff]   ;;  %v96_v12 = vld [vmem:[#allocation2 + $0x90] sm:$0xff] }
  0x62   :  { %1989 = vmatpush3.bf16.msra.mxu1 %v2284_v23  ;;  %v2323_v10 = vld [vmem:[#allocation5 + $0x1f8] sm:$0xff]   ;;  %v82_v15 = vld [vmem:[#allocation2 + $0x20] sm:$0xff]  ;;  %v2325_v18 = vld [vmem:[#allocation5 + $0x240] sm:$0xff]  }
  0x63   :  { %1990 = vmatprep.subr.bf16.mxu1 %v2287_v26  ;;  %v83_v11 = vld [vmem:[#allocation2 + $0x28] sm:$0xff]  ;;  %v85_v19 = vld [vmem:[#allocation2 + $0x38] sm:$0xff]  ;;  %v98_v20 = vld [vmem:[#allocation2 + $0xa0] sm:$0xff] }
  0x64   :  { %1969 = vmatpush3.bf16.msra.mxu0 %v2286_v25  ;;  %v109_v13 = vpack.c.bf16 %v96_v12, %v83_v11  ;;  %v2324_v14 = vld [vmem:[#allocation5 + $0x1b8] sm:$0xff]   ;;  %v111_v21 = vpack.c.bf16 %v98_v20, %v85_v19  ;;  %v2326_v22 = vld [vmem:[#allocation5 + $0x200] sm:$0xff]   ;;  %v97_v24 = vld [vmem:[#allocation2 + $0x98] sm:$0xff] }
  0x65   :  { %1970 = vmatprep.subr.bf16.mxu0 %v2289_v28  ;;  %v95_v16 = vld [vmem:[#allocation2 + $0x88] sm:$0xff]  ;;  %v84_v23 = vld [vmem:[#allocation2 + $0x30] sm:$0xff]  ;;  %v2329_v28 = vld [vmem:[#allocation5 + $0x248] sm:$0xff]  }
  0x66   :  { %1991 = vmatpush3.bf16.msra.mxu1 %v2288_v27  ;;  %v108_v17 = vpack.c.bf16 %v95_v16, %v82_v15  ;;  %v110_v25 = vpack.c.bf16 %v97_v24, %v84_v23  ;;  %v2327_v26 = vld [vmem:[#allocation5 + $0x2c0] sm:$0xff]   ;;  %v2332_v31 = vld [vmem:[#allocation5 + $0x288] sm:$0xff]   ;;  %v2333_v32 = vld [vmem:[#allocation5 + $0x250] sm:$0xff]  }
  0x67   :  { %1992 = vmatprep.subr.bf16.mxu1 %v2291_v30  ;;  %v2328_v27 = vld [vmem:[#allocation5 + $0x280] sm:$0xff]   ;;  %v2331_v30 = vld [vmem:[#allocation5 + $0x2c8] sm:$0xff]   ;;  %v2334_v33 = vld [vmem:[#allocation5 + $0x210] sm:$0xff]  }
  0x68   :  { %1971 = vmatpush3.bf16.msra.mxu0 %v2290_v29  ;;  %v2330_v29 = vld [vmem:[#allocation5 + $0x208] sm:$0xff]   ;;  %v2336_v35 = vld [vmem:[#allocation5 + $0x290] sm:$0xff]   ;;  %v2337_v36 = vld [vmem:[#allocation5 + $0x258] sm:$0xff]  }
  0x69   :  { %2000 = vmatprep.subr.bf16.mxu0 %v2293_v38  ;;  %v2339_v38 = vld [vmem:[#allocation5 + $0x2d8] sm:$0xff]   ;;  %v2341_v40 = vld [vmem:[#allocation5 + $0x260] sm:$0xff]   ;;  %v2345_v44 = vld [vmem:[#allocation5 + $0x268] sm:$0xff]  }
  0x6a   :  { %1993 = vmatpush3.bf16.msra.mxu1 %v2292_v34  ;;  %v2335_v34 = vld [vmem:[#allocation5 + $0x2d0] sm:$0xff]   ;;  %v2340_v39 = vld [vmem:[#allocation5 + $0x298] sm:$0xff]   ;;  %v2342_v41 = vld [vmem:[#allocation5 + $0x220] sm:$0xff]  }
  0x6b   :  { %958 = vmatmul.mubr.bf16.vlgmr.msra.gmra.mrb[0].mxu0 %v104_v37  ;;  %2022 = vmatprep.subr.bf16.mxu1 %v2295_v46  ;;  %v2338_v37 = vld [vmem:[#allocation5 + $0x218] sm:$0xff]   ;;  %v2344_v43 = vld [vmem:[#allocation5 + $0x2a0] sm:$0xff]   ;;  %v2347_v46 = vld [vmem:[#allocation5 + $0x2e8] sm:$0xff]  }
  0x6c   :  { %2001 = vmatpush3.bf16.msra.mxu0 %v2294_v42  ;;  %1039 = vmatprep.mubr.bf16.mxu0 %v109_v13  ;;  %v2343_v42 = vld [vmem:[#allocation5 + $0x2e0] sm:$0xff]   ;;  %v2362_v13 = vld [vmem:[#allocation7 + $0x8] sm:$0xff]   ;;  %v2364_v15 = vld [vmem:[#allocation7 + $0x18] sm:$0xff]  }
  0x6d   :  { %999 = vmatmul.mubr.bf16.vlgmr.msra.gmra.mrb[0].mxu1 %v106_v45  ;;  %2002 = vmatprep.subr.bf16.mxu0 %v2297_v48  ;;  %v2346_v45 = vld [vmem:[#allocation5 + $0x228] sm:$0xff]   ;;  %v2349_v48 = vld [vmem:[#allocation5 + $0x270] sm:$0xff]   ;;  %v2361_v12 = vld [vmem:[#allocation7] sm:$0xff]  }
  0x6e   :  { %2023 = vmatpush3.bf16.msra.mxu1 %v2296_v47  ;;  %1080 = vmatprep.mubr.bf16.mxu1 %v111_v21  ;;  %v2348_v47 = vld [vmem:[#allocation5 + $0x2a8] sm:$0xff]   ;;  %v2365_v16 = vld [vmem:[#allocation7 + $0x20] sm:$0xff]   ;;  %v2368_v19 = vld [vmem:[#allocation7 + $0x38] sm:$0xff]  }
  0x6f   :  { %2024 = vmatprep.subr.bf16.mxu1 %v2299_v50  ;;  %v2351_v50 = vld [vmem:[#allocation5 + $0x2f0] sm:$0xff]   ;;  %v2369_v20 = vld [vmem:[#allocation7 + $0x40] sm:$0xff]   ;;  %v2370_v21 = vld [vmem:[#allocation7 + $0x48] sm:$0xff]  }
  0x70   :  { %2003 = vmatpush3.bf16.msra.mxu0 %v2298_v49  ;;  %v2350_v49 = vld [vmem:[#allocation5 + $0x230] sm:$0xff]   ;;  %v2372_v23 = vld [vmem:[#allocation7 + $0x58] sm:$0xff]   ;;  %v2373_v24 = vld [vmem:[#allocation7 + $0x60] sm:$0xff]  }
  0x71   :  { %2004 = vmatprep.subr.bf16.mxu0 %v2301_v52  ;;  %v2353_v52 = vld [vmem:[#allocation5 + $0x278] sm:$0xff]  }
  0x72   :  { %2025 = vmatpush3.bf16.msra.mxu1 %v2300_v51  ;;  %v2352_v51 = vld [vmem:[#allocation5 + $0x2b0] sm:$0xff]  }
  0x73   :  { %2026 = vmatprep.subr.bf16.mxu1 %v2303_v54  ;;  %v2355_v54 = vld [vmem:[#allocation5 + $0x2f8] sm:$0xff]  }
  0x74   :  { %2005 = vmatpush3.bf16.msra.mxu0 %v2302_v53  ;;  %v2354_v53 = vld [vmem:[#allocation5 + $0x238] sm:$0xff]  }
  0x75   :  { %2006 = vmatprep.subr.bf16.mxu0 %v2305_v56  ;;  %v100_v56 = vld [vmem:[#allocation2 + $0xb0] sm:$0xff] }
  0x76   :  { %2027 = vmatpush3.bf16.msra.mxu1 %v2304_v55  ;;  %v87_v55 = vld [vmem:[#allocation2 + $0x48] sm:$0xff] }
  0x77   :  { %2028 = vmatprep.subr.bf16.mxu1 %v2307_v58  ;;  %v2356_v58 = vld [vmem:[#allocation5 + $0x2b8] sm:$0xff]  }
  0x78   :  { %2007 = vmatpush3.bf16.msra.mxu0 %v2306_v57  ;;  %v113_v57 = vpack.c.bf16 %v100_v56, %v87_v55 }
  0x79   :  { %2008 = vmatprep.subr.bf16.mxu0 %v2309_v60  ;;  %v99_v60 = vld [vmem:[#allocation2 + $0xa8] sm:$0xff] }
  0x7a   :  { %2029 = vmatpush3.bf16.msra.mxu1 %v2308_v59  ;;  %v86_v59 = vld [vmem:[#allocation2 + $0x40] sm:$0xff] }
  0x7b   :  { %2030 = vmatprep.subr.bf16.mxu1 %v2311_v62  ;;  %v89_v62 = vld [vmem:[#allocation2 + $0x58] sm:$0xff] }
  0x7c   :  { %2009 = vmatpush3.bf16.msra.mxu0 %v2310_v61  ;;  %v2527_v61 = vmov 0.0  }
  0x7d   :  { %2010 = vmatprep.subr.bf16.mxu0 %v2313_v0  ;;  %v102_v0 = vld [vmem:[#allocation2 + $0xc0] sm:$0xff] }
  0x7e   :  { %2031 = vmatpush3.bf16.msra.mxu1 %v2312_v63  ;;  %v112_v63 = vpack.c.bf16 %v99_v60, %v86_v59 }
  0x7f   :  { %2032 = vmatprep.subr.bf16.mxu1 %v2315_v2  ;;  %v2357_v2 = vld [vmem:[#allocation5 + $0x300] sm:$0xff]  }
  0x80   :  { %2011 = vmatpush3.bf16.msra.mxu0 %v2314_v1  ;;  %v115_v1 = vpack.c.bf16 %v102_v0, %v89_v62 }
  0x81   :  { %2012 = vmatprep.subr.bf16.mxu0 %v2317_v4  ;;  %v101_v4 = vld [vmem:[#allocation2 + $0xb8] sm:$0xff] }
  0x82   :  { %2033 = vmatpush3.bf16.msra.mxu1 %v2316_v3  ;;  %v88_v3 = vld [vmem:[#allocation2 + $0x50] sm:$0xff] }
  0x83   :  { %2034 = vmatprep.subr.bf16.mxu1 %v2319_v6  ;;  %v2358_v6 = vld [vmem:[#allocation5 + $0x308] sm:$0xff]  }
  0x84   :  { %2013 = vmatpush3.bf16.msra.mxu0 %v2318_v5  ;;  %v114_v5 = vpack.c.bf16 %v101_v4, %v88_v3 }
  0x85   :  { %2014 = vmatprep.subr.bf16.mxu0 %v2321_v8  ;;  %v2360_v8 = vld [vmem:[#allocation5 + $0x318] sm:$0xff]  }
  0x86   :  { %2035 = vmatpush3.bf16.msra.mxu1 %v2320_v7  ;;  %v2359_v7 = vld [vmem:[#allocation5 + $0x310] sm:$0xff]  }
  0x87   :  { %2036 = vmatprep.subr.bf16.mxu1 %v2323_v10  ;;  %v103_v10 = vld [vmem:[#allocation2 + $0xc8] sm:$0xff] }
  0x88   :  { %2015 = vmatpush3.bf16.msra.mxu0 %v2322_v9  ;;  %v90_v9 = vld [vmem:[#allocation2 + $0x60] sm:$0xff] }
  0x89   :  { %2044 = vmatprep.subr.bf16.mxu0 %v2325_v18  ;;  %v116_v11 = vpack.c.bf16 %v103_v10, %v90_v9  ;;  %v2367_v18 = vld [vmem:[#allocation7 + $0x30] sm:$0xff]  }
  0x8a   :  { %2037 = vmatpush3.bf16.msra.mxu1 %v2324_v14  ;;  %v2363_v14 = vld [vmem:[#allocation7 + $0x10] sm:$0xff]  }
  0x8b   :  { %1040 = vmatmul.mubr.bf16.vlgmr.msra.gmra.mrb[4].mxu0 %v108_v17  ;;  %2066 = vmatprep.subr.bf16.mxu1 %v2327_v26  ;;  %v2366_v17 = vld [vmem:[#allocation7 + $0x28] sm:$0xff]   ;;  %v317_v26 = vlaneseq }
  0x8c   :  { %2045 = vmatpush3.bf16.msra.mxu0 %v2326_v22  ;;  %1121 = vmatprep.mubr.bf16.mxu0 %v113_v57  ;;  %v2371_v22 = vld [vmem:[#allocation7 + $0x50] sm:$0xff]  }
  0x8d   :  { %1081 = vmatmul.mubr.bf16.vlgmr.msra.gmra.mrb[4].mxu1 %v110_v25  ;;  %2046 = vmatprep.subr.bf16.mxu0 %v2329_v28  ;;  %v2374_v25 = vld [vmem:[#allocation7 + $0x68] sm:$0xff]  }
  0x8e   :  { %2067 = vmatpush3.bf16.msra.mxu1 %v2328_v27  ;;  %1162 = vmatprep.mubr.bf16.mxu1 %v115_v1  ;;  %v2650_v27 = vshrl.u32 %v317_v26, 7  ;;  %v2376_v26 = vld [vmem:[#allocation7 + $0x78] sm:$0xff]  }
  0x8f   :  { %2068 = vmatprep.subr.bf16.mxu1 %v2331_v30 }
  0x90   :  { %2047 = vmatpush3.bf16.msra.mxu0 %v2330_v29  ;;  %v319_v28 = vsub.s32 0, %v2650_v27  ;;  %v2656_v29 = vld [vmem:[%s2718_s4] sm:$0x3f]  ;;  %s2529_s4 = smov [#allocation10]  }
  0x91   :  { %2048 = vmatprep.subr.bf16.mxu0 %v2333_v32  ;;  %s1792_s19 = sshll.u32 %s2529_s4, 4  ;;  %s1793_s19 = int_to_ptr.vmem [resolvable:$true] %s1792_s19 }
  0x92   :  { %2069 = vmatpush3.bf16.msra.mxu1 %v2332_v31  ;;  %v320_v31 = vrot.slane %v2656_v29, %v319_v28  ;;  %v2377_v28 = vld [vmem:[#allocation7 + $0x80] sm:$0xff]   ;;  %s2489_s20 = scalar_lea.vmem %s1793_s19, 128  ;;  %p2494_p5 = scmp.lt.s32.totalorder %s1793_s19, %s1793_s19 }
  0x93   :  { %2070 = vmatprep.subr.bf16.mxu1 %v2335_v34  ;;  %p2490_p4 = scmp.ne.s32.totalorder %s1793_s19, %s2489_s20  ;;  %p2495_p6 = scmp.lt.s32.totalorder %s2489_s20, %s2489_s20 }
  0x94   :  { %2049 = vmatpush3.bf16.msra.mxu0 %v2334_v33 }
  0x95   :  { %2050 = vmatprep.subr.bf16.mxu0 %v2337_v36  ;;  %p2496_p7 = por %p2495_p6, %p2494_p5 }
  0x96   :  { %2071 = vmatpush3.bf16.msra.mxu1 %v2336_v35 }
  0x97   :  { %2072 = vmatprep.subr.bf16.mxu1 %v2339_v38  ;;  %p2497_p8 = pnand %p2496_p7, %p2490_p4 }
  0x98   :  { %2051 = vmatpush3.bf16.msra.mxu0 %v2338_v37 }
  0x99   :  { %2052 = vmatprep.subr.bf16.mxu0 %v2341_v40 }
  0x9a   :  { %2073 = vmatpush3.bf16.msra.mxu1 %v2340_v39 }
  0x9b   :  { %2074 = vmatprep.subr.bf16.mxu1 %v2343_v42 }
  0x9c   :  { %2053 = vmatpush3.bf16.msra.mxu0 %v2342_v41 }
  0x9d   :  { %2054 = vmatprep.subr.bf16.mxu0 %v2345_v44 }
  0x9e   :  { %2075 = vmatpush3.bf16.msra.mxu1 %v2344_v43 }
  0x9f   :  { %2076 = vmatprep.subr.bf16.mxu1 %v2347_v46 }
  0xa0   :  { %2055 = vmatpush3.bf16.msra.mxu0 %v2346_v45 }
  0xa1   :  { %2056 = vmatprep.subr.bf16.mxu0 %v2349_v48 }
  0xa2   :  { %2077 = vmatpush3.bf16.msra.mxu1 %v2348_v47 }
  0xa3   :  { %2078 = vmatprep.subr.bf16.mxu1 %v2351_v50 }
  0xa4   :  { %2057 = vmatpush3.bf16.msra.mxu0 %v2350_v49 }
  0xa5   :  { %2058 = vmatprep.subr.bf16.mxu0 %v2353_v52 }
  0xa6   :  { %2079 = vmatpush3.bf16.msra.mxu1 %v2352_v51 }
  0xa7   :  { %2080 = vmatprep.subr.bf16.mxu1 %v2355_v54 }
  0xa8   :  { %2059 = vmatpush3.bf16.msra.mxu0 %v2354_v53 }
  0xa9   :  { %2138 = vmatprep.subr.bf16.mxu0 %v2527_v61 }
  0xaa   :  { %2081 = vmatpush3.bf16.msra.mxu1 %v2356_v58 }
  0xab   :  { %2150 = vmatprep.subr.bf16.mxu1 %v2527_v61  ;;  %1122 = vmatmul.mubr.bf16.vlgmr.msra.gmra.mrb[8].mxu0 %v112_v63 }
  0xac   :  { %2139 = vmatpush3.bf16.msra.mxu0 %v2357_v2  ;;  %2146 = vmatprep.mubr.msk.bf16.mxu0 %vm2528_vm0, %v2527_v61 }
  0xad   :  { %1163 = vmatmul.mubr.bf16.vlgmr.msra.gmra.mrb[8].mxu1 %v114_v5  ;;  %2140 = vmatprep.subr.bf16.mxu0 %v2527_v61 }
  0xae   :  { %2166 = vmatprep.mubr.msk.bf16.mxu1 %vm2528_vm0, %v2527_v61  ;;  %2151 = vmatpush3.bf16.msra.mxu1 %v2361_v12 }
  0xaf   :  { %2152 = vmatprep.subr.bf16.mxu1 %v2527_v61 }
  0xb0   :  { %2141 = vmatpush3.bf16.msra.mxu0 %v2358_v6 }
  0xb1   :  { %2142 = vmatprep.subr.bf16.mxu0 %v2527_v61 }
  0xb2   :  { %2153 = vmatpush3.bf16.msra.mxu1 %v2362_v13 }
  0xb3   :  { %2154 = vmatprep.subr.bf16.mxu1 %v2527_v61 }
  0xb4   :  { %2143 = vmatpush3.bf16.msra.mxu0 %v2359_v7 }
  0xb5   :  { %2144 = vmatprep.subr.bf16.mxu0 %v2527_v61 }
  0xb6   :  { %2155 = vmatpush3.bf16.msra.mxu1 %v2363_v14 }
  0xb7   :  { %2156 = vmatprep.subr.bf16.mxu1 %v2527_v61 }
  0xb8   :  { %2145 = vmatpush3.bf16.msra.mxu0 %v2360_v8 }
  0xb9   :  { %2170 = vmatprep.subr.bf16.mxu0 %v2527_v61 }
  0xba   :  { %2157 = vmatpush3.bf16.msra.mxu1 %v2364_v15 }
  0xbb   :  { %2147 = vmatmul.mubr.msk.bf16.vlgmr.msra.gmra.mrb[12].mxu0 %vm921_vm1, %v116_v11  ;;  %2158 = vmatprep.subr.bf16.mxu1 %v2527_v61 }
  0xbc   :  { %2186 = vmatprep.mubr.msk.bf16.mxu0 %vm2528_vm0, %v2527_v61  ;;  %2171 = vmatpush3.bf16.msra.mxu0 %v2369_v20 }
  0xbd   :  { %2172 = vmatprep.subr.bf16.mxu0 %v2527_v61 }
  0xbe   :  { %2159 = vmatpush3.bf16.msra.mxu1 %v2365_v16 }
  0xbf   :  { %2160 = vmatprep.subr.bf16.mxu1 %v2527_v61 }
  0xc0   :  { %2173 = vmatpush3.bf16.msra.mxu0 %v2370_v21 }
  0xc1   :  { %2174 = vmatprep.subr.bf16.mxu0 %v2527_v61 }
  0xc2   :  { %2161 = vmatpush3.bf16.msra.mxu1 %v2366_v17 }
  0xc3   :  { %2162 = vmatprep.subr.bf16.mxu1 %v2527_v61 }
  0xc4   :  { %2175 = vmatpush3.bf16.msra.mxu0 %v2371_v22 }
  0xc5   :  { %2176 = vmatprep.subr.bf16.mxu0 %v2527_v61 }
  0xc6   :  { %2163 = vmatpush3.bf16.msra.mxu1 %v2367_v18 }
  0xc7   :  { %2164 = vmatprep.subr.bf16.mxu1 %v2527_v61 }
  0xc8   :  { %2177 = vmatpush3.bf16.msra.mxu0 %v2372_v23 }
  0xc9   :  { %2178 = vmatprep.subr.bf16.mxu0 %v2527_v61 }
  0xca   :  { %2165 = vmatpush3.bf16.msra.mxu1 %v2368_v19 }
  0xcb   :  { %2190 = vmatprep.subr.bf16.mxu1 %v2527_v61 }
  0xcc   :  { %2179 = vmatpush3.bf16.msra.mxu0 %v2373_v24 }
  0xcd   :  { %2180 = vmatprep.subr.bf16.mxu0 %v2527_v61 }
  0xd0   :  { %2181 = vmatpush3.bf16.msra.mxu0 %v2374_v25  ;;  %v2375_v25 = vld [vmem:[#allocation7 + $0x70] sm:$0xff]  }
  0xd1   :  { %2182 = vmatprep.subr.bf16.mxu0 %v2527_v61 }
  0xd4   :  { %2183 = vmatpush3.bf16.msra.mxu0 %v2375_v25 }
  0xd5   :  { %2184 = vmatprep.subr.bf16.mxu0 %v2527_v61 }
  0xd8   :  { %2185 = vmatpush3.bf16.msra.mxu0 %v2376_v26 }
  0xd9   :  { %2210 = vmatprep.subr.bf16.mxu0 %v2527_v61 }
 0x13e   :  { %v1972_v30 = vpop.f32.mrb[0].mxu0 }
 0x13f   :  { %v1973_v32 = vpop.f32.mrb[1].mxu0 }
 0x140   :  { %v1974_v33 = vadd.f32 %v1973_v32, %v1972_v30  ;;  %v1975_v34 = vpop.f32.mrb[2].mxu0  ;;  %v1994_v35 = vpop.f32.mrb[0].mxu1  ;;  %v2378_v30 = vld [vmem:[#allocation7 + $0x88] sm:$0xff]   ;;  %v2380_v32 = vld [vmem:[#allocation7 + $0x98] sm:$0xff]  }
 0x141   :  { %v1976_v36 = vpop.f32.mrb[3].mxu0  ;;  %v1995_v39 = vpop.f32.mrb[1].mxu1 }
 0x142   :  { %v960_v37 = vadd.f32 %v1974_v33, %v320_v31  ;;  %v1977_v38 = vadd.f32 %v1976_v36, %v1975_v34  ;;  %v1996_v40 = vadd.f32 %v1995_v39, %v1994_v35  ;;  %v1997_v41 = vpop.f32.mrb[2].mxu1  ;;  %v2381_v33 = vld [vmem:[#allocation7 + $0xa0] sm:$0xff]   ;;  %v2382_v34 = vld [vmem:[#allocation7 + $0xa8] sm:$0xff]   ;;  %v1233_v35 = vsub.s32 1, %v2650_v27 }
 0x143   :  { %v1998_v43 = vpop.f32.mrb[3].mxu1 }
 0x144   :  { %v963_v42 = vadd.f32 %v1977_v38, %v320_v31  ;;  %v1001_v44 = vadd.f32 %v1996_v40, %v960_v37  ;;  %v1999_v45 = vadd.f32 %v1998_v43, %v1997_v41  ;;  %v2379_v31 = vld [vmem:[#allocation7 + $0x90] sm:$0xff]   ;;  %v1234_v36 = vrot.slane %v2656_v29, %v1233_v35 }
 0x146   :  { %v1004_v46 = vadd.f32 %v1999_v45, %v963_v42 }
 0x15e   :  { %v2016_v47 = vpop.f32.mrb[4].mxu0 }
 0x15f   :  { %v2017_v48 = vpop.f32.mrb[5].mxu0 }
 0x160   :  { %v2018_v49 = vadd.f32 %v2017_v48, %v2016_v47  ;;  %v2019_v50 = vpop.f32.mrb[6].mxu0  ;;  %v2038_v53 = vpop.f32.mrb[4].mxu1  ;;  %v2384_v47 = vld [vmem:[#allocation7 + $0xb8] sm:$0xff]   ;;  %v2385_v48 = vld [vmem:[#allocation7 + $0xc0] sm:$0xff]  }
 0x161   :  { %v2020_v51 = vpop.f32.mrb[7].mxu0  ;;  %v2039_v55 = vpop.f32.mrb[5].mxu1 }
 0x162   :  { %v1042_v52 = vadd.f32 %v2018_v49, %v1001_v44  ;;  %v2021_v54 = vadd.f32 %v2020_v51, %v2019_v50  ;;  %v2040_v57 = vadd.f32 %v2039_v55, %v2038_v53  ;;  %v2041_v58 = vpop.f32.mrb[6].mxu1  ;;  %v2386_v49 = vld [vmem:[#allocation7 + $0xc8] sm:$0xff]   ;;  %v2387_v50 = vld [vmem:[#allocation7 + $0xd0] sm:$0xff]   ;;  %v2388_v51 = vld [vmem:[#allocation7 + $0xd8] sm:$0xff]  }
 0x163   :  { %v2042_v59 = vpop.f32.mrb[7].mxu1  ;;  %v2390_v53 = vld [vmem:[#allocation7 + $0xe8] sm:$0xff]  }
 0x164   :  { %v1045_v56 = vadd.f32 %v2021_v54, %v1004_v46  ;;  %v1083_v60 = vadd.f32 %v2040_v57, %v1042_v52  ;;  %v2043_v62 = vadd.f32 %v2042_v59, %v2041_v58  ;;  %v2383_v46 = vld [vmem:[#allocation7 + $0xb0] sm:$0xff]   ;;  %v2389_v52 = vld [vmem:[#allocation7 + $0xe0] sm:$0xff]   ;;  %v1346_v54 = vsub.s32 2, %v2650_v27 }
 0x166   :  { %v1086_v63 = vadd.f32 %v2043_v62, %v1045_v56  ;;  %v1347_v55 = vrot.slane %v2656_v29, %v1346_v54 }
 0x17e   :  { %v2060_v0 = vpop.f32.mrb[8].mxu0 }
 0x17f   :  { %v2061_v1 = vpop.f32.mrb[9].mxu0 }
 0x180   :  { %v2062_v2 = vadd.f32 %v2061_v1, %v2060_v0  ;;  %v2063_v3 = vpop.f32.mrb[10].mxu0  ;;  %v2082_v4 = vpop.f32.mrb[8].mxu1 }
 0x181   :  { %v2064_v5 = vpop.f32.mrb[11].mxu0  ;;  %v2083_v6 = vpop.f32.mrb[9].mxu1 }
 0x182   :  { %v1124_v7 = vadd.f32 %v2062_v2, %v1083_v60  ;;  %v2065_v8 = vadd.f32 %v2064_v5, %v2063_v3  ;;  %v2084_v9 = vadd.f32 %v2083_v6, %v2082_v4  ;;  %v2085_v10 = vpop.f32.mrb[10].mxu1  ;;  %v2391_v2 = vld [vmem:[#allocation7 + $0xf0] sm:$0xff]   ;;  %v2392_v3 = vld [vmem:[#allocation7 + $0xf8] sm:$0xff]   ;;  %v2393_v4 = vld [vmem:[#allocation8] sm:$0xff]  }
 0x183   :  { %v2086_v11 = vpop.f32.mrb[11].mxu1  ;;  %v2394_v5 = vld [vmem:[#allocation8 + $0x8] sm:$0xff]   ;;  %v2395_v6 = vld [vmem:[#allocation8 + $0x10] sm:$0xff]  }
 0x184   :  { %v1127_v12 = vadd.f32 %v2065_v8, %v1086_v63  ;;  %v2087_v13 = vadd.f32 %v2086_v11, %v2085_v10  ;;  %v1165_v14 = vadd.f32 %v2084_v9, %v1124_v7  ;;  %v2396_v7 = vld [vmem:[#allocation8 + $0x18] sm:$0xff]   ;;  %v2397_v8 = vld [vmem:[#allocation8 + $0x20] sm:$0xff]   ;;  %v2398_v9 = vld [vmem:[#allocation8 + $0x28] sm:$0xff]   ;;  %v1459_v10 = vsub.s32 3, %v2650_v27 }
 0x186   :  { %v1168_v15 = vadd.f32 %v2087_v13, %v1127_v12  ;;  %v1460_v11 = vrot.slane %v2656_v29, %v1459_v10 }
 0x18e   :  { %v1205_v16 = vpop.f32.mrb[12].mxu0 }
 0x18f   :  { %v1206_v17 = vadd.f32 %v1205_v16, %v1165_v14  ;;  %v2148_v18 = vpop.f32.mrb[13].mxu0 }
 0x190   :  { %v1208_v19 = vpop.f32.mrb[14].mxu0 }
 0x191   :  { %v1209_v20 = vadd.f32 %v1208_v19, %v1168_v15  ;;  %v2149_v21 = vpop.f32.mrb[15].mxu0  ;;  %v1212_v22 = vmax.f32 %v1206_v17, 0.0 }
 0x192   :  { %v2399_v21 = vld [vmem:[#allocation8 + $0x30] sm:$0xff]  }
 0x193   :  { %v1213_v23 = vmax.f32 %v1209_v20, 0.0 }
 0x195   :  { %v1214_v24 = vpack.c.bf16 %v1213_v23, %v1212_v22  ;;  %v2400_v22 = vld [vmem:[#allocation8 + $0x38] sm:$0xff]   ;;  %v1572_v23 = vsub.s32 4, %v2650_v27 }
 0x197   :  { %2167 = vmatmul.mubr.bf16.vlgmr.msra.gmra.mrb[12].mxu1 %v1214_v24  ;;  %v1573_v24 = vrot.slane %v2656_v29, %v1572_v23 }
 0x198   :  { %2206 = vmatprep.mubr.msk.bf16.mxu1 %vm2528_vm0, %v2527_v61  ;;  %2191 = vmatpush3.bf16.msra.mxu1 %v2377_v28 }
 0x199   :  { %2192 = vmatprep.subr.bf16.mxu1 %v2527_v61 }
 0x19c   :  { %2193 = vmatpush3.bf16.msra.mxu1 %v2378_v30 }
 0x19d   :  { %2194 = vmatprep.subr.bf16.mxu1 %v2527_v61 }
 0x1a0   :  { %2195 = vmatpush3.bf16.msra.mxu1 %v2379_v31 }
 0x1a1   :  { %2196 = vmatprep.subr.bf16.mxu1 %v2527_v61 }
 0x1a4   :  { %2197 = vmatpush3.bf16.msra.mxu1 %v2380_v32 }
 0x1a5   :  { %2198 = vmatprep.subr.bf16.mxu1 %v2527_v61 }
 0x1a8   :  { %2199 = vmatpush3.bf16.msra.mxu1 %v2381_v33 }
 0x1a9   :  { %2200 = vmatprep.subr.bf16.mxu1 %v2527_v61 }
 0x1ac   :  { %2201 = vmatpush3.bf16.msra.mxu1 %v2382_v34 }
 0x1ad   :  { %2202 = vmatprep.subr.bf16.mxu1 %v2527_v61 }
 0x1b0   :  { %2203 = vmatpush3.bf16.msra.mxu1 %v2383_v46 }
 0x1b1   :  { %2204 = vmatprep.subr.bf16.mxu1 %v2527_v61 }
 0x1b4   :  { %2205 = vmatpush3.bf16.msra.mxu1 %v2384_v47 }
 0x1b5   :  { %2230 = vmatprep.subr.bf16.mxu1 %v2527_v61 }
 0x26a   :  { %v1317_v37 = vpop.f32.mrb[12].mxu1 }
 0x26b   :  { %v1318_v38 = vadd.f32 %v1317_v37, %v1234_v36  ;;  %v2168_v39 = vpop.f32.mrb[13].mxu1 }
 0x26c   :  { %v1320_v40 = vpop.f32.mrb[14].mxu1 }
 0x26d   :  { %v1321_v41 = vadd.f32 %v1320_v40, %v1234_v36  ;;  %v2169_v42 = vpop.f32.mrb[15].mxu1  ;;  %v1324_v43 = vmax.f32 %v1318_v38, 0.0  ;;  %v1684_v36 = vsub.s32 5, %v2650_v27 }
 0x26f   :  { %v1325_v44 = vmax.f32 %v1321_v41, 0.0 }
 0x271   :  { %v1326_v45 = vpack.c.bf16 %v1325_v44, %v1324_v43 }
 0x273   :  { %2187 = vmatmul.mubr.bf16.vlgmr.msra.gmra.mrb[16].mxu0 %v1326_v45 }
 0x274   :  { %2226 = vmatprep.mubr.msk.bf16.mxu0 %vm2528_vm0, %v2527_v61  ;;  %2211 = vmatpush3.bf16.msra.mxu0 %v2385_v48 }
 0x275   :  { %2212 = vmatprep.subr.bf16.mxu0 %v2527_v61 }
 0x278   :  { %2213 = vmatpush3.bf16.msra.mxu0 %v2386_v49 }
 0x279   :  { %2214 = vmatprep.subr.bf16.mxu0 %v2527_v61 }
 0x27c   :  { %2215 = vmatpush3.bf16.msra.mxu0 %v2387_v50 }
 0x27d   :  { %2216 = vmatprep.subr.bf16.mxu0 %v2527_v61 }
 0x280   :  { %2217 = vmatpush3.bf16.msra.mxu0 %v2388_v51 }
 0x281   :  { %2218 = vmatprep.subr.bf16.mxu0 %v2527_v61 }
 0x284   :  { %2219 = vmatpush3.bf16.msra.mxu0 %v2389_v52 }
 0x285   :  { %2220 = vmatprep.subr.bf16.mxu0 %v2527_v61 }
 0x288   :  { %2221 = vmatpush3.bf16.msra.mxu0 %v2390_v53 }
 0x289   :  { %2222 = vmatprep.subr.bf16.mxu0 %v2527_v61 }
 0x28c   :  { %2223 = vmatpush3.bf16.msra.mxu0 %v2391_v2 }
 0x28d   :  { %2224 = vmatprep.subr.bf16.mxu0 %v2527_v61 }
 0x290   :  { %2225 = vmatpush3.bf16.msra.mxu0 %v2392_v3 }
 0x346   :  { %v1430_v56 = vpop.f32.mrb[16].mxu0 }
 0x347   :  { %v1431_v57 = vadd.f32 %v1430_v56, %v1347_v55  ;;  %v2188_v58 = vpop.f32.mrb[17].mxu0 }
 0x348   :  { %v1433_v59 = vpop.f32.mrb[18].mxu0 }
 0x349   :  { %v1434_v60 = vadd.f32 %v1433_v59, %v1347_v55  ;;  %v2189_v62 = vpop.f32.mrb[19].mxu0  ;;  %v1437_v63 = vmax.f32 %v1431_v57, 0.0 }
 0x34b   :  { %v1438_v0 = vmax.f32 %v1434_v60, 0.0 }
 0x34d   :  { %v1439_v1 = vpack.c.bf16 %v1438_v0, %v1437_v63 }
 0x34f   :  { %2207 = vmatmul.mubr.bf16.vlgmr.msra.gmra.mrb[16].mxu1 %v1439_v1 }
 0x350   :  { %2246 = vmatprep.mubr.msk.bf16.mxu1 %vm2528_vm0, %v2527_v61  ;;  %2231 = vmatpush3.bf16.msra.mxu1 %v2393_v4 }
 0x351   :  { %2232 = vmatprep.subr.bf16.mxu1 %v2527_v61 }
 0x354   :  { %2233 = vmatpush3.bf16.msra.mxu1 %v2394_v5 }
 0x355   :  { %2234 = vmatprep.subr.bf16.mxu1 %v2527_v61 }
 0x358   :  { %2235 = vmatpush3.bf16.msra.mxu1 %v2395_v6 }
 0x359   :  { %2236 = vmatprep.subr.bf16.mxu1 %v2527_v61 }
 0x35c   :  { %2237 = vmatpush3.bf16.msra.mxu1 %v2396_v7 }
 0x35d   :  { %2238 = vmatprep.subr.bf16.mxu1 %v2527_v61 }
 0x360   :  { %2239 = vmatpush3.bf16.msra.mxu1 %v2397_v8 }
 0x361   :  { %2240 = vmatprep.subr.bf16.mxu1 %v2527_v61 }
 0x364   :  { %2241 = vmatpush3.bf16.msra.mxu1 %v2398_v9 }
 0x365   :  { %2242 = vmatprep.subr.bf16.mxu1 %v2527_v61 }
 0x368   :  { %2243 = vmatpush3.bf16.msra.mxu1 %v2399_v21 }
 0x369   :  { %2244 = vmatprep.subr.bf16.mxu1 %v2527_v61  ;;  %v1685_v61 = vrot.slane %v2656_v29, %v1684_v36 }
 0x36c   :  { %2245 = vmatpush3.bf16.msra.mxu1 %v2400_v22 }
 0x422   :  { %v1543_v12 = vpop.f32.mrb[16].mxu1 }
 0x423   :  { %v1544_v13 = vadd.f32 %v1543_v12, %v1460_v11  ;;  %v2208_v14 = vpop.f32.mrb[17].mxu1 }
 0x424   :  { %v1546_v15 = vpop.f32.mrb[18].mxu1 }
 0x425   :  { %v1547_v16 = vadd.f32 %v1546_v15, %v1460_v11  ;;  %v2209_v17 = vpop.f32.mrb[19].mxu1  ;;  %v1550_v18 = vmax.f32 %v1544_v13, 0.0 }
 0x427   :  { %v1551_v19 = vmax.f32 %v1547_v16, 0.0 }
 0x429   :  { %v1552_v20 = vpack.c.bf16 %v1551_v19, %v1550_v18 }
 0x42b   :  { %2227 = vmatmul.mubr.bf16.vlgmr.msra.gmra.mrb[20].mxu0 %v1552_v20 }
 0x4fe   :  { %v1656_v25 = vpop.f32.mrb[20].mxu0 }
 0x4ff   :  { %v1657_v26 = vadd.f32 %v1656_v25, %v1573_v24  ;;  %v2228_v28 = vpop.f32.mrb[21].mxu0 }
 0x500   :  { %v1659_v30 = vpop.f32.mrb[22].mxu0 }
 0x501   :  { %v1660_v31 = vadd.f32 %v1659_v30, %v1573_v24  ;;  %v2229_v32 = vpop.f32.mrb[23].mxu0  ;;  %v1663_v33 = vmax.f32 %v1657_v26, 0.0 }
 0x503   :  { %v1664_v34 = vmax.f32 %v1660_v31, 0.0 }
 0x505   :  { %v1665_v35 = vpack.c.bf16 %v1664_v34, %v1663_v33 }
 0x507   :  { %2247 = vmatmul.mubr.bf16.vlgmr.msra.gmra.mrb[20].mxu1 %v1665_v35 }
 0x5da   :  { %v1768_v37 = vpop.f32.mrb[20].mxu1 }
 0x5db   :  { %v1769_v38 = vadd.f32 %v1768_v37, %v1685_v61  ;;  %v2248_v39 = vpop.f32.mrb[21].mxu1 }
 0x5dc   :  { %v1771_v40 = vpop.f32.mrb[22].mxu1 }
 0x5dd   :  { %v1772_v41 = vadd.f32 %v1771_v40, %v1685_v61  ;;  %v2249_v42 = vpop.f32.mrb[23].mxu1  ;;  %v1775_v43 = vmax.f32 %v1769_v38, 0.0 }
 0x5df   :  { %v1776_v44 = vmax.f32 %v1772_v41, 0.0 }
 0x5e1   :  { %v1954_v45 = vpack.c.bf16 %v1776_v44, %v1775_v43 }
 0x5e3   :  { %1955 = vst [vmem:[#allocation10] sm:$0xff] %v1954_v45  }
 0x5e4   :  { %2500 = shalt.err (!%p2497_p8)
}
 0x5e5   :  { %s2501_s23 = scalar_lea.hbm %s2719_s5, 128 }
 0x5e6   :  { %p2502_p9 = scmp.ne.s32.totalorder %s2719_s5, %s2501_s23  ;;  %p2505_p10 = scmp.lt.u32.totalorder %s2501_s23, %s2719_s5 }
 0x5e8   :  { %p2507_p11 = pnand %p2505_p10, %p2502_p9 }
 0x5ea   :  { %2510 = shalt.err (!%p2507_p11)
}
 0x5eb   :  { %1798 = dma.vmem_to_hbm [thread:$0]  %s1793_s19, 128, %s2719_s5, [#allocation4], %s2520_s28, %s2520_s28, %s2521_s29  }
 0x5ec   :  { %2517 = dma.done.wait [#allocation4], 128  }
 0x5ed   :  { %2518 = vsyncadd [#allocation4], 4294967168 }
 0x5ee   :  { %1802 = vsyncpa [#allocation3], 1 }
 0x5ef   :  { %1803 = vsyncpa [#allocation6], 1 }
 0x5f0   :  { %1804 = vsyncpa [#allocation9], 1 }
 0x5f1   :  { %1805 = vsyncpa [#allocation4], 1 }

</bundles_post_ra>
